<compile_context>
chip_gen: v7x
topology: tpu7x:2x2x1
jax: 0.10.0
libtpu: 0.0.40
codegen_flags: <defaults>
</compile_context>

<pallas_src>
import jax
import jax.numpy as jnp
from jax.experimental import pallas as pl
from jax.experimental.pallas import tpu as pltpu

EPS = 1e-9
LANE = 128


def _round_up(v, m):
    return (v + m - 1) // m * m


def _graph_norm_ref(x, gamma, beta):
    """Plain-JAX reference / tiny-shape fallback (same math as the module)."""
    xf = x.astype(jnp.float32)
    n = x.shape[0]
    mean = jnp.mean(xf, axis=0, keepdims=True)
    var = jnp.sum((xf - mean) ** 2, axis=0, keepdims=True) / n
    out = (beta.astype(jnp.float32) * ((xf - mean) / jnp.sqrt(var + EPS))
           + gamma.astype(jnp.float32))
    return out.astype(x.dtype)


def _graph_norm_kernel(gb_ref, x_ref, o_ref):
    # x_ref: (N, tf) stripe; gb_ref: (2, tf) with row 0 = gamma, row 1 = beta.
    x = x_ref[...].astype(jnp.float32)
    inv_n = 1.0 / x.shape[0]                 # full (global) N is resident here
    mean = jnp.sum(x, axis=0, keepdims=True) * inv_n                # (1, tf)
    # Two-pass variance (no catastrophic cancellation).  (x - mean) is
    # recomputed in the store below instead of being kept live as a full array.
    var = jnp.sum((x - mean) * (x - mean), axis=0, keepdims=True) * inv_n
    gamma = gb_ref[0:1, :]
    beta = gb_ref[1:2, :]
    scale = beta * jax.lax.rsqrt(var + EPS)                          # (1, tf)
    o_ref[...] = ((x - mean) * scale + gamma).astype(o_ref.dtype)


def graph_norm(x, gamma, beta, *,
               target_stripe_bytes=2 * 1024 * 1024,
               min_pallas_bytes=128 * 1024):
    """x: (N, F); gamma/beta: (F,). Returns (N, F) in x.dtype."""
    N, F = x.shape
    gamma = gamma.astype(jnp.float32)
    beta = beta.astype(jnp.float32)

    # Tiny-shape bypass: fixed kernel launch overhead dwarfs the work.
    if N * F * x.dtype.itemsize < min_pallas_bytes:
        return _graph_norm_ref(x, gamma, beta)

    # --- stripe width selection (lane-dense, VMEM-budgeted) -----------------
    Fp = _round_up(F, LANE)
    col_bytes = N * 4                                    # f32 sizing
    tf = max(LANE, (target_stripe_bytes // col_bytes) // LANE * LANE)
    tf = min(tf, Fp)
    # Give v7x's two TensorCores >= 2 stripes when the array is big enough.
    if tf == Fp and Fp >= 2 * LANE and N * Fp * 4 >= (1 << 20):
        tf = _round_up(Fp // 2, LANE)
    num_blocks = pl.cdiv(F, tf)
    Gp = num_blocks * tf

    # Pad only gamma/beta (cheap) and stack them into one (2, Gp) input.
    gb = jnp.stack([jnp.pad(gamma, (0, Gp - F)),
                    jnp.pad(beta, (0, Gp - F))])

    # Explicit VMEM budget: double-buffered in + out stripes, gamma/beta, plus
    # headroom for in-kernel f32 temporaries.  Capped at 48 MiB (v7x-safe).
    stripe_bytes = N * tf * x.dtype.itemsize
    footprint = 4 * stripe_bytes + 4 * Gp * 4
    vmem_limit = int(min(48 * 1024 * 1024, max(32 * 1024 * 1024, 3 * footprint)))

    return pl.pallas_call(
        _graph_norm_kernel,
        out_shape=jax.ShapeDtypeStruct((N, F), x.dtype),
        grid=(num_blocks,),
        in_specs=[
            pl.BlockSpec((2, tf), lambda j: (0, j)),   # gamma/beta stripe (tiny)
            pl.BlockSpec((N, tf), lambda j: (0, j)),   # x: full N, F striped
        ],
        out_specs=pl.BlockSpec((N, tf), lambda j: (0, j)),
        compiler_params=pltpu.CompilerParams(
            dimension_semantics=("parallel",),         # F stripes independent
            vmem_limit_bytes=vmem_limit,
        ),
    )(gb, x)


if __name__ == "__main__":
    key = jax.random.PRNGKey(0)

    # Module-scale example: num = F = 32 features, N = 8 nodes.
    N, F = 8, 32
    x = jax.random.normal(key, (N, F), dtype=jnp.float32)
    gamma = jnp.zeros((F,), jnp.float32)   # module init: gamma = zeros(num)
    beta = jnp.ones((F,), jnp.float32)     # module init: beta  = ones(num)

    # Force the Pallas path (the bypass would normally handle a shape this tiny).
    out = graph_norm(x, gamma, beta, min_pallas_bytes=0)
    out = jax.block_until_ready(out)
    ref = _graph_norm_ref(x, gamma, beta)
    assert out.shape == (N, F), f"bad shape {out.shape}"
    assert jnp.allclose(out, ref, atol=1e-5, rtol=1e-5), "mismatch vs reference"

    # Ragged-F case: exercises the masked tail block (F not a multiple of 128)
    # with non-trivial affine parameters.
    k1, k2, k3 = jax.random.split(jax.random.PRNGKey(0), 3)
    N2, F2 = 16, 200
    x2 = jax.random.normal(k1, (N2, F2), dtype=jnp.float32)
    gamma2 = 0.1 * jax.random.normal(k2, (F2,), dtype=jnp.float32)
    beta2 = 1.0 + 0.1 * jax.random.normal(k3, (F2,), dtype=jnp.float32)
    out2 = jax.block_until_ready(graph_norm(x2, gamma2, beta2, min_pallas_bytes=0))
    ref2 = _graph_norm_ref(x2, gamma2, beta2)
    assert jnp.allclose(out2, ref2, atol=1e-5, rtol=1e-5), "mismatch (ragged F)"

    # Tiny-shape bypass path (plain jnp).
    out3 = jax.block_until_ready(graph_norm(x, gamma, beta))
    assert jnp.allclose(out3, ref, atol=1e-6, rtol=1e-6), "mismatch (bypass)"

    print("KERNEL_OK")
</pallas_src>

<mosaic_0001>
module attributes {stable_mosaic.version = 11 : i64} {
  func.func @_graph_norm_kernel(%arg0: i32, %arg1: memref<2x128xf32, #tpu.memory_space<vmem>>, %arg2: memref<8x128xf32, #tpu.memory_space<vmem>>, %arg3: memref<8x128xf32, #tpu.memory_space<vmem>>) attributes {dimension_semantics = [#tpu.dimension_semantics<parallel>], iteration_bounds = array<i64: 1>, scalar_prefetch = 0 : i64, scratch_operands = 0 : i64, tpu.core_type = #tpu.core_type<tc>, window_params = [{transform_indices = @transform_0, window_bounds = array<i64: 2, 128>}, {transform_indices = @transform_1, window_bounds = array<i64: 8, 128>}, {transform_indices = @transform_2, window_bounds = array<i64: 8, 128>}]} {
    %c0 = arith.constant 0 : index
    %c0_0 = arith.constant 0 : index
    %0 = vector.load %arg2[%c0, %c0_0] : memref<8x128xf32, #tpu.memory_space<vmem>>, vector<8x128xf32>
    %cst = arith.constant dense<0.000000e+00> : vector<128xf32>
    %1 = vector.multi_reduction <add>, %0, %cst [0] : vector<8x128xf32> to vector<128xf32>
    %2 = vector.shape_cast %1 : vector<128xf32> to vector<1x128xf32>
    %cst_1 = arith.constant 1.250000e-01 : f32
    %3 = vector.broadcast %cst_1 : f32 to vector<1x128xf32>
    %4 = arith.mulf %2, %3 : vector<1x128xf32>
    %5 = vector.broadcast %4 : vector<1x128xf32> to vector<8x128xf32>
    %6 = arith.subf %0, %5 : vector<8x128xf32>
    %7 = vector.broadcast %4 : vector<1x128xf32> to vector<8x128xf32>
    %8 = arith.subf %0, %7 : vector<8x128xf32>
    %9 = arith.mulf %6, %8 : vector<8x128xf32>
    %cst_2 = arith.constant dense<0.000000e+00> : vector<128xf32>
    %10 = vector.multi_reduction <add>, %9, %cst_2 [0] : vector<8x128xf32> to vector<128xf32>
    %11 = vector.shape_cast %10 : vector<128xf32> to vector<1x128xf32>
    %cst_3 = arith.constant 1.250000e-01 : f32
    %12 = vector.broadcast %cst_3 : f32 to vector<1x128xf32>
    %13 = arith.mulf %11, %12 : vector<1x128xf32>
    %c0_4 = arith.constant 0 : index
    %c0_5 = arith.constant 0 : index
    %14 = vector.load %arg1[%c0_4, %c0_5] : memref<2x128xf32, #tpu.memory_space<vmem>>, vector<1x128xf32>
    %c1 = arith.constant 1 : index
    %c0_6 = arith.constant 0 : index
    %15 = vector.load %arg1[%c1, %c0_6] : memref<2x128xf32, #tpu.memory_space<vmem>>, vector<1x128xf32>
    %cst_7 = arith.constant 9.99999971E-10 : f32
    %16 = vector.broadcast %cst_7 : f32 to vector<1x128xf32>
    %17 = arith.addf %13, %16 : vector<1x128xf32>
    %18 = math.rsqrt %17 : vector<1x128xf32>
    %19 = arith.mulf %15, %18 : vector<1x128xf32>
    %20 = vector.broadcast %4 : vector<1x128xf32> to vector<8x128xf32>
    %21 = arith.subf %0, %20 : vector<8x128xf32>
    %22 = vector.broadcast %19 : vector<1x128xf32> to vector<8x128xf32>
    %23 = arith.mulf %21, %22 : vector<8x128xf32>
    %24 = vector.broadcast %14 : vector<1x128xf32> to vector<8x128xf32>
    %25 = arith.addf %23, %24 : vector<8x128xf32>
    %c0_8 = arith.constant 0 : index
    %c0_9 = arith.constant 0 : index
    %26 = vector.load %arg3[%c0_8, %c0_9] : memref<8x128xf32, #tpu.memory_space<vmem>>, vector<8x128xf32>
    tpu.vector_store %arg3[%c0_8, %c0_9], %25 {strides = array<i32>} : memref<8x128xf32, #tpu.memory_space<vmem>>, vector<8x128xf32>,
    return
  }
  func.func @transform_0(%arg0: i32) -> (i32, i32) {
    %c0_i32 = arith.constant 0 : i32
    %c0_i32_0 = arith.constant 0 : i32
    return %c0_i32, %arg0 : i32, i32
  }
  func.func @transform_1(%arg0: i32) -> (i32, i32) {
    %c0_i32 = arith.constant 0 : i32
    %c0_i32_0 = arith.constant 0 : i32
    return %c0_i32, %arg0 : i32, i32
  }
  func.func @transform_2(%arg0: i32) -> (i32, i32) {
    %c0_i32 = arith.constant 0 : i32
    %c0_i32_0 = arith.constant 0 : i32
    return %c0_i32, %arg0 : i32, i32
  }
}

</mosaic_0001>

<bundles_post_ra>
// kernel: tpu_custom_call.1
= control target key start
LH: loop header
LB: loop body
LE: loop exit
PB: predicated region body
PF: predicated region fallthrough
CT: control target
= control target key end

     0   :  { %7 = vsyncpa [#allocation3], 0  ;;  %s217_s0 = inlined_call_operand.hbm [shape: f32[2,128], index: 0, kind: input, shape index: {}]   ;;  %s218_s1 = inlined_call_operand.hbm [shape: f32[8,32], index: 1, kind: input, shape index: {}]   ;;  %s219_s2 = inlined_call_operand.hbm [shape: f32[8,32], index: 2, kind: output, shape index: {}]  }
   0x1   :  { %8 = vsyncpa [#allocation6], 0 }
   0x2   :  { %9 = vsyncpa [#allocation4], 0  ;;  %s163_s9 = smov [#allocation2]   ;;  %s164_s11 = smov [#allocation5]  }
   0x3   :  { %s16_s10 = sshll.u32 %s163_s9, 4  ;;  %s26_s12 = sshll.u32 %s164_s11, 4  ;;  %s17_s10 = int_to_ptr.vmem [resolvable:$true] %s16_s10  ;;  %s27_s12 = int_to_ptr.vmem [resolvable:$true] %s26_s12 }
   0x4   :  { %s91_s15 = scalar_lea.hbm %s217_s0, 32 }
   0x5   :  { %p92_p0 = scmp.ne.s32.totalorder %s217_s0, %s91_s15  ;;  %p95_p1 = scmp.lt.u32.totalorder %s91_s15, %s217_s0 }
   0x7   :  { %p97_p2 = pnand %p95_p1, %p92_p0 }
   0x9   :  { %100 = shalt.err (!%p97_p2)
}
   0xa   :  { %s101_s20 = scalar_lea.vmem %s17_s10, 32  ;;  %p106_p4 = scmp.lt.s32.totalorder %s17_s10, %s17_s10 }
   0xb   :  { %p102_p3 = scmp.ne.s32.totalorder %s17_s10, %s101_s20  ;;  %p107_p5 = scmp.lt.s32.totalorder %s101_s20, %s101_s20 }
   0xd   :  { %p108_p6 = por %p107_p5, %p106_p4 }
   0xf   :  { %p109_p7 = pnand %p108_p6, %p102_p3 }
  0x11   :  { %112 = shalt.err (!%p109_p7)
}
  0x12   :  { %19 = dma.hbm_to_vmem [thread:$0]  %s217_s0, 32, %s17_s10, [#allocation3]  }
  0x13   :  { %s113_s25 = scalar_lea.hbm %s218_s1, 128 }
  0x14   :  { %p114_p8 = scmp.ne.s32.totalorder %s218_s1, %s113_s25  ;;  %p117_p9 = scmp.lt.u32.totalorder %s113_s25, %s218_s1 }
  0x16   :  { %p119_p10 = pnand %p117_p9, %p114_p8 }
  0x18   :  { %122 = shalt.err (!%p119_p10)
}
  0x19   :  { %s123_s30 = scalar_lea.vmem %s27_s12, 128  ;;  %p128_p12 = scmp.lt.s32.totalorder %s27_s12, %s27_s12 }
  0x1a   :  { %p124_p11 = scmp.ne.s32.totalorder %s27_s12, %s123_s30  ;;  %p129_p13 = scmp.lt.s32.totalorder %s123_s30, %s123_s30 }
  0x1c   :  { %p130_p0 = por %p129_p13, %p128_p12 }
  0x1e   :  { %p131_p1 = pnand %p130_p0, %p124_p11 }
  0x20   :  { %134 = shalt.err (!%p131_p1)
}
  0x21   :  { %29 = dma.hbm_to_vmem [thread:$0]  %s218_s1, 128, %s27_s12, [#allocation6]  }
  0x22   :  { %157 = dma.done.wait [#allocation3], 32  }
  0x23   :  { %158 = vsyncadd [#allocation3], 4294967264 }
  0x24   :  { %159 = dma.done.wait [#allocation6], 128  }
  0x25   :  { %160 = vsyncadd [#allocation6], 4294967168  ;;  %v36_v0 = vld [vmem:[#allocation5] sm:$0xff]  ;;  %v58_v18 = vlaneseq  ;;  %v54_v20 = vld [vmem:[#allocation2 + $0x1] sm:$0x1]  ;;  %s165_s1 = smov [#allocation7]  }
  0x26   :  { %v37_v1 = vrot.slane %v36_v0, 4  ;;  %v85_v25 = vld [vmem:[#allocation2] ss:$0 sm:$0xff]  ;;  %s75_s4 = sshll.u32 %s165_s1, 4  ;;  %s76_s4 = int_to_ptr.vmem [resolvable:$true] %s75_s4 }
  0x27   :  { %v59_v19 = vshrl.u32 %v58_v18, 7  ;;  %s135_s5 = scalar_lea.vmem %s76_s4, 128  ;;  %p140_p3 = scmp.lt.s32.totalorder %s76_s4, %s76_s4 }
  0x28   :  { %v38_v2 = vadd.f32 %v37_v1, %v36_v0  ;;  %p136_p2 = scmp.ne.s32.totalorder %s76_s4, %s135_s5  ;;  %p141_p4 = scmp.lt.s32.totalorder %s135_s5, %s135_s5 }
  0x29   :  { %v60_v21 = vsub.s32 0, %v59_v19 }
  0x2a   :  { %v39_v3 = vrot.slane %v38_v2, 2  ;;  %p142_p5 = por %p141_p4, %p140_p3 }
  0x2c   :  { %v40_v4 = vadd.f32 %v39_v3, %v38_v2  ;;  %p143_p6 = pnand %p142_p5, %p136_p2 }
  0x2e   :  { %v41_v5 = vrot.slane %v40_v4, 1 }
  0x30   :  { %v42_v6 = vadd.f32 %v41_v5, %v40_v4 }
  0x32   :  { %v43_v7 = vmul.f32 0.125, %v42_v6 }
  0x34   :  { %v44_v8 = vsub.f32 %v36_v0, %v43_v7 }
  0x36   :  { %v45_v9 = vmul.f32 %v44_v8, %v44_v8 }
  0x38   :  { %v46_v10 = vrot.slane %v45_v9, 4 }
  0x3a   :  { %v47_v11 = vadd.f32 %v46_v10, %v45_v9 }
  0x3c   :  { %v48_v12 = vrot.slane %v47_v11, 2 }
  0x3e   :  { %v49_v13 = vadd.f32 %v48_v12, %v47_v11 }
  0x40   :  { %v50_v14 = vrot.slane %v49_v13, 1 }
  0x42   :  { %v51_v15 = vadd.f32 %v50_v14, %v49_v13 }
  0x44   :  { %v52_v16 = vmul.f32 0.125, %v51_v15 }
  0x46   :  { %v55_v17 = vadd.f32 1e-09, %v52_v16 }
  0x48   :  { %89 = vrsqrt.f32 %v55_v17 }
  0x52   :  { %v90_v22 = vpop.eup %89 }
  0x53   :  { %v57_v23 = vmul.f32 %v90_v22, %v54_v20 }
  0x55   :  { %v61_v24 = vrot.slane %v57_v23, %v60_v21 }
  0x57   :  { %v62_v26 = vmul.f32 %v61_v24, %v44_v8 }
  0x59   :  { %v67_v27 = vadd.f32 %v85_v25, %v62_v26 }
  0x5b   :  { %68 = vst [vmem:[#allocation7] sm:$0xff] %v67_v27 }
  0x5c   :  { %146 = shalt.err (!%p143_p6)
}
  0x5d   :  { %s147_s8 = scalar_lea.hbm %s219_s2, 128 }
  0x5e   :  { %p148_p7 = scmp.ne.s32.totalorder %s219_s2, %s147_s8  ;;  %p151_p8 = scmp.lt.u32.totalorder %s147_s8, %s219_s2 }
  0x60   :  { %p153_p9 = pnand %p151_p8, %p148_p7 }
  0x62   :  { %156 = shalt.err (!%p153_p9)
}
  0x63   :  { %78 = dma.vmem_to_hbm [thread:$0]  %s76_s4, 128, %s219_s2, [#allocation4]  }
  0x64   :  { %161 = dma.done.wait [#allocation4], 128  }
  0x65   :  { %162 = vsyncadd [#allocation4], 4294967168 }
  0x66   :  { %82 = vsyncpa [#allocation3], 1 }
  0x67   :  { %83 = vsyncpa [#allocation6], 1 }
  0x68   :  { %84 = vsyncpa [#allocation4], 1 }

</bundles_post_ra>
